<compile_context>
chip_gen: v5e
topology: v5e:2x2
jax: 0.10.0
libtpu: 0.0.40
codegen_flags: <defaults>
</compile_context>

<pallas_src>
import functools

import jax
import jax.numpy as jnp
from jax import lax
from jax.experimental import pallas as pl
from jax.experimental.pallas import tpu as pltpu

MARGIN = 2.0
EPS = 1e-9
LANE = 128        # TPU lane width (last dim of every tile)
ACC_ROWS = 64     # accumulator block rows: 8 f32 vregs -> 8 independent chains


def _round_up(x, m):
    return ((x + m - 1) // m) * m


def _default_num_parallel():
    """2 parallel chunks only on 2-TensorCore chips (v7x); 1 otherwise."""
    try:
        kind = jax.devices()[0].device_kind.lower()
    except Exception:
        return 1
    return 2 if ("v7" in kind or "7x" in kind) else 1


def _contrastive_partial_kernel(d_ref, t_ref, out_ref, *, margin, eps,
                                steps, tiles_total, tile_m, total_elems,
                                mask_needed):
    """grid = (parallel chunks, reduction steps).

    out_ref is a (ACC_ROWS, 128) f32 block resident across the inner
    (reduction) axis; it acts as an 8-vreg accumulator so the hot loop is
    pure VPU adds (the single cross-lane reduce happens once in the wrapper).
    Only the last real tile (and any duplicate clamped tiles) takes the
    masked path, gated by pl.when, so the hot path is branch- and mask-free.
    """
    p = pl.program_id(0)
    j = pl.program_id(1)

    @pl.when(j == 0)
    def _init():
        out_ref[...] = jnp.zeros_like(out_ref)

    d = d_ref[...].astype(jnp.float32)
    t = t_ref[...].astype(jnp.float32)

    hinge = jnp.maximum(margin - jnp.sqrt(d + eps), 0.0)
    hh = hinge * hinge
    # 0.5*(t*d + (1-t)*hh) == 0.5*(t*(d - hh) + hh); the 0.5 is applied in the
    # wrapper epilogue (saves ~2 VALU ops/element).
    losses = t * (d - hh) + hh

    def _accumulate(vals):
        # (tile_m, 128) -> (tile_m//64, 64, 128) -> sum over leading axis:
        # elementwise vreg adds only, 8 independent accumulation chains.
        out_ref[...] += vals.reshape(-1, ACC_ROWS, LANE).sum(axis=0)

    if not mask_needed:
        # Statically known fully-aligned case: no masking anywhere.
        _accumulate(losses)
    else:
        tile_idx = p * steps + j          # un-clamped global tile index
        last_tile = tiles_total - 1

        @pl.when(tile_idx < last_tile)
        def _hot():                        # full, fully-valid tiles
            _accumulate(losses)

        @pl.when(tile_idx >= last_tile)
        def _tail():
            # Last real tile may be partially out-of-bounds / past `total`;
            # duplicate (clamped) tiles of trailing parallel chunks land here
            # too and mask to all-zero.  jnp.where (select) is used so that
            # NaN/Inf garbage from the un-DMA'd region cannot poison the sum.
            row = lax.broadcasted_iota(jnp.int32, (tile_m, LANE), 0)
            lane = lax.broadcasted_iota(jnp.int32, (tile_m, LANE), 1)
            flat = tile_idx * (tile_m * LANE) + row * LANE + lane
            _accumulate(jnp.where(flat < total_elems, losses, 0.0))


def contrastive_loss(distances, target, size_average=True, *,
                     margin=MARGIN, eps=EPS, tile_m=4096, num_parallel=None):
    """Pallas TPU implementation of ContrastiveLoss.forward (any input shape)."""
    assert distances.shape == target.shape
    if target.dtype == jnp.bool_:
        # i1 refs are awkward in Mosaic; int8 keeps the narrow-dtype bandwidth win.
        target = target.astype(jnp.int8)

    total = int(distances.size)
    assert total > 0
    assert total < 2**31, "int32 flat-index masking assumes < 2^31 elements"
    rows = pl.cdiv(total, LANE)

    if num_parallel is None:
        num_parallel = _default_num_parallel()
    num_parallel = max(1, int(num_parallel))

    # Tile sizing: multiple of ACC_ROWS rows (also satisfies the (32,128)
    # tiling of int8 inputs), no bigger than one parallel chunk needs.
    tile_m = max(ACC_ROWS,
                 min(int(tile_m),
                     _round_up(pl.cdiv(rows, num_parallel), ACC_ROWS)))
    tile_m = _round_up(tile_m, ACC_ROWS)

    # The array passed to Pallas: only pad rows up when the whole input is
    # smaller than one tile (tiny input -> negligible copy).
    rows_arr = max(rows, tile_m)
    tiles_total = pl.cdiv(rows_arr, tile_m)
    num_parallel = max(1, min(num_parallel, tiles_total))
    steps = pl.cdiv(tiles_total, num_parallel)

    padded_total = rows_arr * LANE
    pad = padded_total - total

    d_flat = distances.reshape(-1)
    t_flat = target.reshape(-1)
    if pad:
        # Only taken when total is not a multiple of 128 (sub-row ragged) or
        # the input is smaller than one tile; pad values are irrelevant
        # because the kernel masks by the true element count.
        d_flat = jnp.pad(d_flat, (0, pad))
        t_flat = jnp.pad(t_flat, (0, pad))
    d2 = d_flat.reshape(rows_arr, LANE)
    t2 = t_flat.reshape(rows_arr, LANE)

    # Static specialization: if every tile is full and every element valid,
    # emit no masking code at all.
    mask_needed = total != num_parallel * steps * tile_m * LANE

    kernel = functools.partial(
        _contrastive_partial_kernel,
        margin=float(margin), eps=float(eps),
        steps=steps, tiles_total=tiles_total, tile_m=tile_m,
        total_elems=total, mask_needed=mask_needed)

    # Clamp the block index so trailing parallel chunks never issue a DMA for
    # a fully out-of-bounds block; their (duplicate) contribution masks to 0.
    def in_map(p, j):
        return (jnp.minimum(p * steps + j, tiles_total - 1), 0)

    in_spec = pl.BlockSpec((tile_m, LANE), in_map)

    d_bytes = total * jnp.dtype(distances.dtype).itemsize
    t_bytes = total * jnp.dtype(target.dtype).itemsize
    out_bytes = num_parallel * ACC_ROWS * LANE * 4
    work_elems = num_parallel * steps * tile_m * LANE

    partials = pl.pallas_call(
        kernel,
        out_shape=jax.ShapeDtypeStruct((num_parallel * ACC_ROWS, LANE),
                                       jnp.float32),
        grid_spec=pltpu.PrefetchScalarGridSpec(
            num_scalar_prefetch=0,
            grid=(num_parallel, steps),
            in_specs=[in_spec, in_spec],
            out_specs=pl.BlockSpec((ACC_ROWS, LANE), lambda p, j: (p, 0)),
        ),
        compiler_params=pltpu.CompilerParams(
            dimension_semantics=("parallel", "arbitrary"),
            vmem_limit_bytes=48 * 1024 * 1024),
        cost_estimate=pl.CostEstimate(
            flops=8 * work_elems,
            transcendentals=work_elems,
            bytes_accessed=d_bytes + t_bytes + out_bytes),
    )(d2, t2)

    # Single cross-lane/sublane reduction + the folded 0.5, once, in JAX.
    total_sum = 0.5 * jnp.sum(partials)
    if size_average:
        return total_sum / jnp.float32(total)
    return total_sum


def _reference(distances, target, size_average=True, margin=MARGIN, eps=EPS):
    d = distances.astype(jnp.float32)
    t = target.astype(jnp.float32)
    hinge = jnp.maximum(margin - jnp.sqrt(d + eps), 0.0)
    losses = 0.5 * (t * d + (1.0 - t) * hinge ** 2)
    return losses.mean() if size_average else losses.sum()


if __name__ == "__main__":
    key = jax.random.PRNGKey(0)
    k1, k2, k3, k4, k5, k6 = jax.random.split(key, 6)

    # Test 1: ragged shape (1600 elements, not a multiple of 128) and smaller
    # than one tile -> exercises the tiny-input pad + in-kernel tail masking.
    d1 = jax.random.uniform(k1, (16, 100), jnp.float32, 0.0, 4.0)
    t1 = jax.random.bernoulli(k2, 0.5, (16, 100)).astype(jnp.float32)
    out1_mean = contrastive_loss(d1, t1, size_average=True)
    out1_sum = contrastive_loss(d1, t1, size_average=False)

    # Test 2: small tile_m + forced num_parallel=2 -> multiple reduction
    # steps, a partial trailing tile, and a duplicate (clamped) tile on the
    # second parallel chunk.  Bool target exercises the narrow-dtype path.
    d2 = jax.random.uniform(k3, (300, 70), jnp.float32, 0.0, 4.0)
    t2 = jax.random.bernoulli(k4, 0.5, (300, 70))
    out2_mean = contrastive_loss(d2, t2, size_average=True,
                                 tile_m=64, num_parallel=2)
    out2_sum = contrastive_loss(d2, t2, size_average=False,
                                tile_m=64, num_parallel=2)

    # Test 3: perfectly aligned shape -> static no-mask specialization,
    # int8 target.
    d3 = jax.random.uniform(k5, (64, 128), jnp.float32, 0.0, 4.0)
    t3 = jax.random.bernoulli(k6, 0.5, (64, 128)).astype(jnp.int8)
    out3_mean = contrastive_loss(d3, t3, size_average=True)
    out3_sum = contrastive_loss(d3, t3, size_average=False)

    jax.block_until_ready((out1_mean, out1_sum, out2_mean, out2_sum,
                           out3_mean, out3_sum))

    ref1_mean = _reference(d1, t1, True)
    ref1_sum = _reference(d1, t1, False)
    ref2_mean = _reference(d2, t2, True)
    ref2_sum = _reference(d2, t2, False)
    ref3_mean = _reference(d3, t3, True)
    ref3_sum = _reference(d3, t3, False)

    assert jnp.allclose(out1_mean, ref1_mean, rtol=1e-4, atol=1e-5), (out1_mean, ref1_mean)
    assert jnp.allclose(out1_sum, ref1_sum, rtol=1e-4, atol=1e-3), (out1_sum, ref1_sum)
    assert jnp.allclose(out2_mean, ref2_mean, rtol=1e-4, atol=1e-5), (out2_mean, ref2_mean)
    assert jnp.allclose(out2_sum, ref2_sum, rtol=1e-4, atol=1e-3), (out2_sum, ref2_sum)
    assert jnp.allclose(out3_mean, ref3_mean, rtol=1e-4, atol=1e-5), (out3_mean, ref3_mean)
    assert jnp.allclose(out3_sum, ref3_sum, rtol=1e-4, atol=1e-3), (out3_sum, ref3_sum)

    print("KERNEL_OK")
</pallas_src>

<mosaic_0001>
module attributes {stable_mosaic.version = 11 : i64} {
  func.func @_contrastive_partial_kernel(%arg0: i32, %arg1: i32, %arg2: memref<64x128xf32, #tpu.memory_space<vmem>>, %arg3: memref<64x128xf32, #tpu.memory_space<vmem>>, %arg4: memref<64x128xf32, #tpu.memory_space<vmem>>) attributes {dimension_semantics = [#tpu.dimension_semantics<parallel>, #tpu.dimension_semantics<arbitrary>], iteration_bounds = array<i64: 1, 1>, scalar_prefetch = 0 : i64, scratch_operands = 0 : i64, tpu.core_type = #tpu.core_type<tc>, window_params = [{transform_indices = @transform_0, window_bounds = array<i64: 64, 128>}, {transform_indices = @transform_1, window_bounds = array<i64: 64, 128>}, {transform_indices = @transform_2, window_bounds = array<i64: 64, 128>}]} {
    %c0_i32 = arith.constant 0 : i32
    %0 = arith.cmpi eq, %arg1, %c0_i32 : i32
    %1 = arith.extui %0 : i1 to i32
    %c0_i32_0 = arith.constant 0 : i32
    %2 = arith.cmpi ne, %1, %c0_i32_0 : i32
    scf.if %2 {
      %cst_10 = arith.constant 0.000000e+00 : f32
      %24 = vector.broadcast %cst_10 : f32 to vector<64x128xf32>
      %c0_11 = arith.constant 0 : index
      %c0_12 = arith.constant 0 : index
      %25 = vector.load %arg4[%c0_11, %c0_12] : memref<64x128xf32, #tpu.memory_space<vmem>>, vector<64x128xf32>
      tpu.vector_store %arg4[%c0_11, %c0_12], %24 {strides = array<i32>} : memref<64x128xf32, #tpu.memory_space<vmem>>, vector<64x128xf32>,
    } else {
    }
    %c0 = arith.constant 0 : index
    %c0_1 = arith.constant 0 : index
    %3 = vector.load %arg2[%c0, %c0_1] : memref<64x128xf32, #tpu.memory_space<vmem>>, vector<64x128xf32>
    %c0_2 = arith.constant 0 : index
    %c0_3 = arith.constant 0 : index
    %4 = vector.load %arg3[%c0_2, %c0_3] : memref<64x128xf32, #tpu.memory_space<vmem>>, vector<64x128xf32>
    %cst = arith.constant 9.99999971E-10 : f32
    %5 = vector.broadcast %cst : f32 to vector<64x128xf32>
    %6 = arith.addf %3, %5 : vector<64x128xf32>
    %7 = math.sqrt %6 : vector<64x128xf32>
    %cst_4 = arith.constant 2.000000e+00 : f32
    %8 = vector.broadcast %cst_4 : f32 to vector<64x128xf32>
    %9 = arith.subf %8, %7 : vector<64x128xf32>
    %cst_5 = arith.constant 0.000000e+00 : f32
    %10 = vector.broadcast %cst_5 : f32 to vector<64x128xf32>
    %11 = arith.maximumf %9, %10 : vector<64x128xf32>
    %12 = arith.mulf %11, %11 : vector<64x128xf32>
    %13 = arith.subf %3, %12 : vector<64x128xf32>
    %14 = arith.mulf %4, %13 : vector<64x128xf32>
    %15 = arith.addf %14, %12 : vector<64x128xf32>
    %c1_i32 = arith.constant 1 : i32
    %16 = arith.muli %arg0, %c1_i32 : i32
    %17 = arith.addi %16, %arg1 : i32
    %c0_i32_6 = arith.constant 0 : i32
    %18 = arith.cmpi slt, %17, %c0_i32_6 : i32
    %19 = arith.extui %18 : i1 to i32
    %c0_i32_7 = arith.constant 0 : i32
    %20 = arith.cmpi ne, %19, %c0_i32_7 : i32
    scf.if %20 {
      %c0_10 = arith.constant 0 : index
      %c0_11 = arith.constant 0 : index
      %24 = vector.load %arg4[%c0_10, %c0_11] : memref<64x128xf32, #tpu.memory_space<vmem>>, vector<64x128xf32>
      %25 = vector.shape_cast %15 : vector<64x128xf32> to vector<1x64x128xf32>
      %cst_12 = arith.constant dense<0.000000e+00> : vector<64x128xf32>
      %26 = vector.multi_reduction <add>, %25, %cst_12 [0] : vector<1x64x128xf32> to vector<64x128xf32>
      %27 = arith.addf %24, %26 : vector<64x128xf32>
      %c0_13 = arith.constant 0 : index
      %c0_14 = arith.constant 0 : index
      %28 = vector.load %arg4[%c0_13, %c0_14] : memref<64x128xf32, #tpu.memory_space<vmem>>, vector<64x128xf32>
      tpu.vector_store %arg4[%c0_13, %c0_14], %27 {strides = array<i32>} : memref<64x128xf32, #tpu.memory_space<vmem>>, vector<64x128xf32>,
    } else {
    }
    %c0_i32_8 = arith.constant 0 : i32
    %21 = arith.cmpi sge, %17, %c0_i32_8 : i32
    %22 = arith.extui %21 : i1 to i32
    %c0_i32_9 = arith.constant 0 : i32
    %23 = arith.cmpi ne, %22, %c0_i32_9 : i32
    scf.if %23 {
      %24 = tpu.iota {dimensions = array<i32: 0>} : vector<64x128xi32>
      %25 = tpu.iota {dimensions = array<i32: 1>} : vector<64x128xi32>
      %c8192_i32 = arith.constant 8192 : i32
      %26 = arith.muli %17, %c8192_i32 : i32
      %c128_i32 = arith.constant 128 : i32
      %27 = vector.broadcast %c128_i32 : i32 to vector<64x128xi32>
      %28 = arith.muli %24, %27 : vector<64x128xi32>
      %29 = vector.broadcast %26 : i32 to vector<64x128xi32>
      %30 = arith.addi %29, %28 : vector<64x128xi32>
      %31 = arith.addi %30, %25 : vector<64x128xi32>
      %c1600_i32 = arith.constant 1600 : i32
      %32 = vector.broadcast %c1600_i32 : i32 to vector<64x128xi32>
      %33 = arith.cmpi slt, %31, %32 : vector<64x128xi32>
      %cst_10 = arith.constant 0.000000e+00 : f32
      %34 = vector.broadcast %cst_10 : f32 to vector<64x128xf32>
      %35 = arith.select %33, %15, %34 : vector<64x128xi1>, vector<64x128xf32>
      %c0_11 = arith.constant 0 : index
      %c0_12 = arith.constant 0 : index
      %36 = vector.load %arg4[%c0_11, %c0_12] : memref<64x128xf32, #tpu.memory_space<vmem>>, vector<64x128xf32>
      %37 = vector.shape_cast %35 : vector<64x128xf32> to vector<1x64x128xf32>
      %cst_13 = arith.constant dense<0.000000e+00> : vector<64x128xf32>
      %38 = vector.multi_reduction <add>, %37, %cst_13 [0] : vector<1x64x128xf32> to vector<64x128xf32>
      %39 = arith.addf %36, %38 : vector<64x128xf32>
      %c0_14 = arith.constant 0 : index
      %c0_15 = arith.constant 0 : index
      %40 = vector.load %arg4[%c0_14, %c0_15] : memref<64x128xf32, #tpu.memory_space<vmem>>, vector<64x128xf32>
      tpu.vector_store %arg4[%c0_14, %c0_15], %39 {strides = array<i32>} : memref<64x128xf32, #tpu.memory_space<vmem>>, vector<64x128xf32>,
    } else {
    }
    return
  }
  func.func @transform_0(%arg0: i32, %arg1: i32) -> (i32, i32) {
    %c1_i32 = arith.constant 1 : i32
    %0 = arith.muli %arg0, %c1_i32 : i32
    %1 = arith.addi %0, %arg1 : i32
    %c0_i32 = arith.constant 0 : i32
    %2 = arith.minsi %1, %c0_i32 : i32
    %c0_i32_0 = arith.constant 0 : i32
    %c0_i32_1 = arith.constant 0 : i32
    return %2, %c0_i32_0 : i32, i32
  }
  func.func @transform_1(%arg0: i32, %arg1: i32) -> (i32, i32) {
    %c1_i32 = arith.constant 1 : i32
    %0 = arith.muli %arg0, %c1_i32 : i32
    %1 = arith.addi %0, %arg1 : i32
    %c0_i32 = arith.constant 0 : i32
    %2 = arith.minsi %1, %c0_i32 : i32
    %c0_i32_0 = arith.constant 0 : i32
    %c0_i32_1 = arith.constant 0 : i32
    return %2, %c0_i32_0 : i32, i32
  }
  func.func @transform_2(%arg0: i32, %arg1: i32) -> (i32, i32) {
    %c0_i32 = arith.constant 0 : i32
    %c0_i32_0 = arith.constant 0 : i32
    return %arg0, %c0_i32 : i32, i32
  }
}

</mosaic_0001>

<bundles_post_ra>
// kernel: tpu_custom_call.1
= control target key start
LH: loop header
LB: loop body
LE: loop exit
PB: predicated region body
PF: predicated region fallthrough
CT: control target
= control target key end

     0   :  { %7 = vsyncpa [#allocation3], 0  ;;  %s712_s0 = inlined_call_operand.hbm [shape: f32[64,128], index: 0, kind: input, shape index: {}]   ;;  %s713_s1 = inlined_call_operand.hbm [shape: f32[64,128], index: 1, kind: input, shape index: {}]   ;;  %s714_s2 = inlined_call_operand.hbm [shape: f32[64,128], index: 2, kind: output, shape index: {}]  }
   0x1   :  { %8 = vsyncpa [#allocation6], 0 }
   0x2   :  { %9 = vsyncpa [#allocation4], 0  ;;  %s20_s11 = sshll.u32 %s712_s0, 4  ;;  %s494_s12 = smov [#allocation2]   ;;  %s21_s11 = int_to_ptr.hbm [resolvable:$true] %s20_s11 }
   0x3   :  { %s22_s13 = sshll.u32 %s494_s12, 4  ;;  %s39_s16 = sshll.u32 %s713_s1, 4  ;;  %s23_s13 = int_to_ptr.vmem [resolvable:$true] %s22_s13  ;;  %s40_s16 = int_to_ptr.hbm [resolvable:$true] %s39_s16 }
   0x4   :  { %s495_s17 = smov 128   ;;  %s496_s18 = smov 8  }
   0x5   :  { %28 = dma.hbm_to_vmem [thread:$0]  %s21_s11, 1024, %s23_s13, [#allocation3], %s495_s17, %s495_s17, %s496_s18  }
   0x6   :  { %s497_s19 = smov [#allocation5]  }
   0x7   :  { %s41_s20 = sshll.u32 %s497_s19, 4  ;;  %s42_s20 = int_to_ptr.vmem [resolvable:$true] %s41_s20 }
   0x8   :  { %47 = dma.hbm_to_vmem [thread:$0]  %s40_s16, 1024, %s42_s20, [#allocation6], %s495_s17, %s495_s17, %s496_s18  }
   0x9   :  { %488 = dma.done.wait [#allocation3], 1024  }
   0xa   :  { %489 = vsyncadd [#allocation3], 4294966272 }
   0xb   :  { %490 = dma.done.wait [#allocation6], 1024  }
   0xc   :  { %491 = vsyncadd [#allocation6], 4294966272  ;;  %v285_v0 = vlaneseq  ;;  %v528_v2 = vld [vmem:[#allocation2] sm:$0xff]  ;;  %v530_v3 = vld [vmem:[#allocation2 + $0x8] sm:$0xff]  ;;  %s498_s0 = smov [#allocation7]   ;;  %s376_s23 = sshll.u32 %s714_s2, 4  ;;  %s377_s23 = int_to_ptr.hbm [resolvable:$true] %s376_s23 }
   0xd   :  { %v533_v4 = vadd.f32 1e-09, %v528_v2  ;;  %v536_v5 = vadd.f32 1e-09, %v530_v3  ;;  %v538_v6 = vld [vmem:[#allocation2 + $0x10] sm:$0xff]  ;;  %v545_v9 = vld [vmem:[#allocation2 + $0x18] sm:$0xff] }
   0xe   :  { %v526_v1 = vshrl.u32 %v285_v0, 7  ;;  %v542_v8 = vadd.f32 1e-09, %v538_v6  ;;  %v548_v10 = vld [vmem:[#allocation2 + $0x20] sm:$0xff]  ;;  %v550_v11 = vld [vmem:[#allocation2 + $0x28] sm:$0xff]  ;;  %v554_v13 = vand.u32 127, %v285_v0 }
   0xf   :  { %400 = vrsqrt.f32 %v533_v4  ;;  %v558_v16 = vadd.f32 1e-09, %v545_v9  ;;  %v561_v17 = vadd.f32 1e-09, %v548_v10  ;;  %v564_v18 = vadd.f32 1e-09, %v550_v11 }
  0x10   :  { %v287_v7 = vadd.s32 8, %v526_v1  ;;  %402 = vrsqrt.f32 %v536_v5  ;;  %v288_v12 = vadd.s32 16, %v526_v1  ;;  %v297_v14 = vmul.u32 128, %v526_v1  ;;  %v581_v30 = vld [vmem:[#allocation2 + $0x30] sm:$0xff]  ;;  %s374_s1 = sshll.u32 %s498_s0, 4  ;;  %s375_s1 = int_to_ptr.vmem [resolvable:$true] %s374_s1 }
  0x11   :  { %404 = vrsqrt.f32 %v542_v8  ;;  %v110_v23 = vand.u32 2147483648, %v533_v4  ;;  %vm107_vm0 = vcmp.eq.f32.partialorder %v533_v4, inf  ;;  %v289_v28 = vadd.s32 24, %v526_v1 }
  0x12   :  { %v298_v15 = vmul.u32 128, %v287_v7  ;;  %406 = vrsqrt.f32 %v558_v16  ;;  %v299_v20 = vmul.u32 128, %v288_v12  ;;  %v571_v24 = vadd.s32 %v297_v14, %v554_v13 }
  0x13   :  { %408 = vrsqrt.f32 %v561_v17  ;;  %v290_v29 = vadd.s32 32, %v526_v1  ;;  %vm109_vm1 = vcmp.eq.f32.partialorder %v533_v4, 0.0  ;;  %vm119_vm2 = vcmp.eq.f32.partialorder %v536_v5, inf }
  0x14   :  { %v574_v25 = vadd.s32 %v298_v15, %v554_v13  ;;  %410 = vrsqrt.f32 %v564_v18  ;;  %v122_v32 = vand.u32 2147483648, %v536_v5  ;;  %vm121_vm3 = vcmp.eq.f32.partialorder %v536_v5, 0.0 }
  0x15   :  { %v401_v19 = vpop.eup %400  ;;  %vm131_vm4 = vcmp.eq.f32.partialorder %v542_v8, inf  ;;  %v134_v35 = vand.u32 2147483648, %v542_v8  ;;  %v591_v36 = vadd.s32 %v299_v20, %v554_v13  ;;  %vm133_vm5 = vcmp.eq.f32.partialorder %v542_v8, 0.0 }
  0x16   :  { %v403_v21 = vpop.eup %402  ;;  %v101_v22 = vmul.f32 %v401_v19, %v533_v4  ;;  %v146_v40 = vand.u32 2147483648, %v558_v16  ;;  %v596_v41 = vadd.f32 1e-09, %v581_v30  ;;  %v300_v45 = vmul.u32 128, %v289_v28 }
  0x17   :  { %v405_v26 = vpop.eup %404  ;;  %v113_v27 = vmul.f32 %v403_v21, %v536_v5  ;;  %v301_v46 = vmul.u32 128, %v290_v29  ;;  %vm143_vm6 = vcmp.eq.f32.partialorder %v558_v16, inf  ;;  %vm145_vm7 = vcmp.eq.f32.partialorder %v558_v16, 0.0 }
  0x18   :  { %v102_v31 = vmul.f32 %v401_v19, %v101_v22  ;;  %v125_v33 = vmul.f32 %v405_v26, %v542_v8  ;;  %v407_v37 = vpop.eup %406  ;;  %412 = vrsqrt.f32 %v596_v41  ;;  %vm155_vm8 = vcmp.eq.f32.partialorder %v561_v17, inf }
  0x19   :  { %v114_v34 = vmul.f32 %v403_v21, %v113_v27  ;;  %v409_v42 = vpop.eup %408  ;;  %v137_v44 = vmul.f32 %v407_v37, %v558_v16  ;;  %v158_v53 = vand.u32 2147483648, %v561_v17  ;;  %v291_v54 = vadd.s32 40, %v526_v1 }
  0x1a   :  { %v103_v38 = vmul.f32 0.5, %v102_v31  ;;  %v126_v39 = vmul.f32 %v405_v26, %v125_v33  ;;  %v149_v49 = vmul.f32 %v409_v42, %v561_v17  ;;  %v411_v50 = vpop.eup %410  ;;  %vm157_vm9 = vcmp.eq.f32.partialorder %v561_v17, 0.0 }
  0x1b   :  { %v115_v43 = vmul.f32 0.5, %v114_v34  ;;  %v138_v52 = vmul.f32 %v407_v37, %v137_v44  ;;  %v161_v58 = vmul.f32 %v411_v50, %v564_v18  ;;  %v609_v61 = vadd.s32 %v300_v45, %v554_v13 }
  0x1c   :  { %v104_v47 = vsub.f32 1.5, %v103_v38  ;;  %v127_v48 = vmul.f32 0.5, %v126_v39  ;;  %v150_v57 = vmul.f32 %v409_v42, %v149_v49  ;;  %v612_v62 = vadd.s32 %v301_v46, %v554_v13 }
  0x1d   :  { %v116_v51 = vsub.f32 1.5, %v115_v43  ;;  %v139_v60 = vmul.f32 0.5, %v138_v52  ;;  %v162_v12 = vmul.f32 %v411_v50, %v161_v58  ;;  %vm167_vm10 = vcmp.eq.f32.partialorder %v564_v18, inf }
  0x1e   :  { %v105_v55 = vmul.f32 %v401_v19, %v104_v47  ;;  %v128_v56 = vsub.f32 1.5, %v127_v48  ;;  %v151_v7 = vmul.f32 0.5, %v150_v57  ;;  %vm169_vm11 = vcmp.eq.f32.partialorder %v564_v18, 0.0 }
  0x1f   :  { %v117_v59 = vmul.f32 %v403_v21, %v116_v51  ;;  %v140_v15 = vsub.f32 1.5, %v139_v60  ;;  %v170_v19 = vand.u32 2147483648, %v564_v18  ;;  %v302_v20 = vmul.u32 128, %v291_v54  ;;  %v619_v21 = vpop.eup %412  ;;  %v85_v60 = vld [vmem:[#allocation5 + $0x8] sm:$0xff] }
  0x20   :  { %v106_v63 = vmul.f32 %v105_v55, %v533_v4  ;;  %v129_v0 = vmul.f32 %v405_v26, %v128_v56  ;;  %v152_v27 = vsub.f32 1.5, %v151_v7  ;;  %v163_v28 = vmul.f32 0.5, %v162_v12  ;;  %v84_v55 = vld [vmem:[#allocation5] sm:$0xff]  ;;  %v86_v7 = vld [vmem:[#allocation5 + $0x10] sm:$0xff] }
  0x21   :  { %v118_v14 = vmul.f32 %v117_v59, %v536_v5  ;;  %v141_v33 = vmul.f32 %v407_v37, %v140_v15  ;;  %v173_v34 = vmul.f32 %v619_v21, %v596_v41  ;;  %vm322_vm12 = vcmp.lt.s32.totalorder %v571_v24, 1600 }
  0x22   :  { %v108_v22 = vsel %vm107_vm0, %v533_v4, %v106_v63  ;;  %v130_v26 = vmul.f32 %v129_v0, %v542_v8  ;;  %v153_v44 = vmul.f32 %v409_v42, %v152_v27  ;;  %v164_v45 = vsub.f32 1.5, %v163_v28 }
  0x23   :  { %v111_v29 = vsel %vm109_vm1, %v110_v23, %v108_v22  ;;  %v120_v31 = vsel %vm119_vm2, %v536_v5, %v118_v14  ;;  %v142_v37 = vmul.f32 %v141_v33, %v558_v16  ;;  %vm323_vm13 = vcmp.lt.s32.totalorder %v574_v25, 1600  ;;  %v87_v33 = vld [vmem:[#allocation5 + $0x18] sm:$0xff] }
  0x24   :  { %v196_v38 = vsub.f32 2.0, %v111_v29  ;;  %v123_v39 = vsel %vm121_vm3, %v122_v32, %v120_v31  ;;  %v132_v43 = vsel %vm131_vm4, %v542_v8, %v130_v26  ;;  %v154_v5 = vmul.f32 %v153_v44, %v561_v17  ;;  %v88_v44 = vld [vmem:[#allocation5 + $0x20] sm:$0xff] }
  0x25   :  { %v197_v4 = vsub.f32 2.0, %v123_v39  ;;  %v135_v23 = vsel %vm133_vm5, %v134_v35, %v132_v43  ;;  %v174_v32 = vmul.f32 %v619_v21, %v173_v34  ;;  %vm324_vm14 = vcmp.lt.s32.totalorder %v591_v36, 1600 }
  0x26   :  { %v204_v46 = vmax.f32 %v196_v38, 0.0  ;;  %v198_v47 = vsub.f32 2.0, %v135_v23  ;;  %v144_v42 = vsel %vm143_vm6, %v558_v16, %v142_v37  ;;  %v165_v8 = vmul.f32 %v411_v50, %v164_v45 }
  0x27   :  { %v205_v48 = vmax.f32 %v197_v4, 0.0  ;;  %v651_v35 = vadd.s32 %v302_v20, %v554_v13  ;;  %v147_v52 = vsel %vm145_vm7, %v146_v40, %v144_v42  ;;  %v156_v54 = vsel %vm155_vm8, %v561_v17, %v154_v5  ;;  %v89_v5 = vld [vmem:[#allocation5 + $0x28] sm:$0xff] }
  0x28   :  { %v212_v49 = vmul.f32 %v204_v46, %v204_v46  ;;  %v206_v51 = vmax.f32 %v198_v47, 0.0  ;;  %v199_v57 = vsub.f32 2.0, %v147_v52  ;;  %v159_v50 = vsel %vm157_vm9, %v158_v53, %v156_v54  ;;  %v673_v53 = vld [vmem:[#allocation2 + $0x38] sm:$0xff] }
  0x29   :  { %v213_v56 = vmul.f32 %v205_v48, %v205_v48  ;;  %v166_v58 = vmul.f32 %v165_v8, %v564_v18  ;;  %vm179_vm15 = vcmp.eq.f32.partialorder %v596_v41, inf  ;;  %vm325_vm0 = vcmp.lt.s32.totalorder %v609_v61, 1600 }
  0x2a   :  { %v220_v59 = vsub.f32 %v528_v2, %v212_v49  ;;  %v214_v63 = vmul.f32 %v206_v51, %v206_v51  ;;  %v200_v16 = vsub.f32 2.0, %v159_v50  ;;  %v175_v40 = vmul.f32 0.5, %v174_v32 }
  0x2b   :  { %vm181_vm1 = vcmp.eq.f32.partialorder %v596_v41, 0.0  ;;  %v221_v0 = vsub.f32 %v530_v3, %v213_v56  ;;  %v207_v12 = vmax.f32 %v199_v57, 0.0  ;;  %vm326_vm2 = vcmp.lt.s32.totalorder %v612_v62, 1600 }
  0x2c   :  { %v168_v17 = vsel %vm167_vm10, %v564_v18, %v166_v58  ;;  %v182_v2 = vand.u32 2147483648, %v596_v41  ;;  %v228_v14 = vmul.f32 %v220_v59, %v84_v55  ;;  %v222_v15 = vsub.f32 %v538_v6, %v214_v63  ;;  %v90_v58 = vld [vmem:[#allocation5 + $0x30] sm:$0xff] }
  0x2d   :  { %v208_v20 = vmax.f32 %v200_v16, 0.0  ;;  %v171_v22 = vsel %vm169_vm11, %v170_v19, %v168_v17  ;;  %v229_v3 = vmul.f32 %v221_v0, %v85_v60  ;;  %v215_v26 = vmul.f32 %v207_v12, %v207_v12 }
  0x2e   :  { %v201_v27 = vsub.f32 2.0, %v171_v22  ;;  %v176_v28 = vsub.f32 1.5, %v175_v40  ;;  %v236_v29 = vadd.f32 %v228_v14, %v212_v49  ;;  %v230_v31 = vmul.f32 %v222_v15, %v86_v7 }
  0x2f   :  { %v216_v34 = vmul.f32 %v208_v20, %v208_v20  ;;  %v99_v38 = vadd.f32 1e-09, %v673_v53  ;;  %v237_v39 = vadd.f32 %v229_v3, %v213_v56  ;;  %v223_v43 = vsub.f32 %v545_v9, %v215_v26 }
  0x30   :  { %v209_v4 = vmax.f32 %v201_v27, 0.0  ;;  %v177_v6 = vmul.f32 %v619_v21, %v176_v28  ;;  %v330_v18 = vsel %vm322_vm12, %v236_v29, 0.0  ;;  %v238_v19 = vadd.f32 %v230_v31, %v214_v63 }
  0x31   :  { %v224_v23 = vsub.f32 %v548_v10, %v216_v34  ;;  %414 = vrsqrt.f32 %v99_v38  ;;  %v331_v37 = vsel %vm323_vm13, %v237_v39, 0.0  ;;  %v231_v45 = vmul.f32 %v223_v43, %v87_v33  ;;  %362 = vst [vmem:[#allocation7] sm:$0xff] %v330_v18 }
  0x32   :  { %v217_v46 = vmul.f32 %v209_v4, %v209_v4  ;;  %v332_v47 = vsel %vm324_vm14, %v238_v19, 0.0  ;;  %v178_v32 = vmul.f32 %v177_v6, %v596_v41  ;;  %v292_v48 = vadd.s32 48, %v526_v1  ;;  %363 = vst [vmem:[#allocation7 + $0x8] sm:$0xff] %v331_v37 }
  0x33   :  { %v232_v9 = vmul.f32 %v224_v23, %v88_v44  ;;  %v239_v21 = vadd.f32 %v231_v45, %v215_v26  ;;  %364 = vst [vmem:[#allocation7 + $0x10] sm:$0xff] %v332_v47  ;;  %vm327_vm3 = vcmp.lt.s32.totalorder %v651_v35, 1600  ;;  %vm191_vm5 = vcmp.eq.f32.partialorder %v99_v38, inf }
  0x34   :  { %v225_v24 = vsub.f32 %v550_v11, %v217_v46  ;;  %v180_v25 = vsel %vm179_vm15, %v596_v41, %v178_v32  ;;  %v303_v54 = vmul.u32 128, %v292_v48  ;;  %v194_v40 = vand.u32 2147483648, %v99_v38 }
  0x35   :  { %v240_v10 = vadd.f32 %v232_v9, %v216_v34  ;;  %v333_v36 = vsel %vm325_vm0, %v239_v21, 0.0  ;;  %v183_v8 = vsel %vm181_vm1, %v182_v2, %v180_v25  ;;  %vm193_vm6 = vcmp.eq.f32.partialorder %v99_v38, 0.0 }
  0x36   :  { %v233_v42 = vmul.f32 %v225_v24, %v89_v5  ;;  %v202_v51 = vsub.f32 2.0, %v183_v8  ;;  %365 = vst [vmem:[#allocation7 + $0x18] sm:$0xff] %v333_v36  ;;  %v320_v41 = vadd.s32 %v303_v54, %v554_v13  ;;  %v293_v12 = vadd.s32 56, %v526_v1 }
  0x37   :  { %v415_v49 = vpop.eup %414  ;;  %v334_v11 = vsel %vm326_vm2, %v240_v10, 0.0 }
  0x38   :  { %v241_v52 = vadd.f32 %v233_v42, %v217_v46  ;;  %v185_v55 = vmul.f32 %v415_v49, %v99_v38  ;;  %v210_v56 = vmax.f32 %v202_v51, 0.0  ;;  %366 = vst [vmem:[#allocation7 + $0x20] sm:$0xff] %v334_v11  ;;  %vm328_vm4 = vcmp.lt.s32.totalorder %v320_v41, 1600 }
  0x39   :  { %v304_v15 = vmul.u32 128, %v293_v12 }
  0x3a   :  { %v335_v57 = vsel %vm327_vm3, %v241_v52, 0.0  ;;  %v186_v61 = vmul.f32 %v415_v49, %v185_v55  ;;  %v218_v50 = vmul.f32 %v210_v56, %v210_v56 }
  0x3b   :  { %367 = vst [vmem:[#allocation7 + $0x28] sm:$0xff] %v335_v57  ;;  %v321_v3 = vadd.s32 %v304_v15, %v554_v13 }
  0x3c   :  { %v187_v59 = vmul.f32 0.5, %v186_v61  ;;  %v226_v62 = vsub.f32 %v581_v30, %v218_v50  ;;  %v91_v30 = vld [vmem:[#allocation5 + $0x38] sm:$0xff] }
  0x3d   :  { %vm329_vm7 = vcmp.lt.s32.totalorder %v321_v3, 1600 }
  0x3e   :  { %v188_v60 = vsub.f32 1.5, %v187_v59  ;;  %v234_v63 = vmul.f32 %v226_v62, %v90_v58 }
  0x40   :  { %v189_v35 = vmul.f32 %v415_v49, %v188_v60  ;;  %v242_v16 = vadd.f32 %v234_v63, %v218_v50 }
  0x42   :  { %v190_v0 = vmul.f32 %v189_v35, %v99_v38  ;;  %v336_v7 = vsel %vm328_vm4, %v242_v16, 0.0 }
  0x43   :  { %368 = vst [vmem:[#allocation7 + $0x30] sm:$0xff] %v336_v7 }
  0x44   :  { %v192_v17 = vsel %vm191_vm5, %v99_v38, %v190_v0 }
  0x45   :  { %v195_v2 = vsel %vm193_vm6, %v194_v40, %v192_v17 }
  0x46   :  { %v203_v14 = vsub.f32 2.0, %v195_v2 }
  0x48   :  { %v211_v20 = vmax.f32 %v203_v14, 0.0 }
  0x4a   :  { %v219_v22 = vmul.f32 %v211_v20, %v211_v20 }
  0x4c   :  { %v227_v26 = vsub.f32 %v673_v53, %v219_v22 }
  0x4e   :  { %v235_v27 = vmul.f32 %v227_v26, %v91_v30 }
  0x50   :  { %v243_v28 = vadd.f32 %v235_v27, %v219_v22 }
  0x52   :  { %v337_v1 = vsel %vm329_vm7, %v243_v28, 0.0 }
  0x53   :  { %369 = vst [vmem:[#allocation7 + $0x38] sm:$0xff] %v337_v1 }
  0x54   :  { %382 = dma.vmem_to_hbm [thread:$0]  %s375_s1, 1024, %s377_s23, [#allocation4], %s495_s17, %s495_s17, %s496_s18  }
  0x55   :  { %492 = dma.done.wait [#allocation4], 1024  }
  0x56   :  { %493 = vsyncadd [#allocation4], 4294966272 }
  0x57   :  { %387 = vsyncpa [#allocation3], 1 }
  0x58   :  { %388 = vsyncpa [#allocation6], 1 }
  0x59   :  { %389 = vsyncpa [#allocation4], 1 }

</bundles_post_ra>
